<compile_context>
chip_gen: v7x
topology: tpu7x:2x2x1
jax: 0.10.0
libtpu: 0.0.40
codegen_flags: <defaults>
</compile_context>

<pallas_src>
import functools

import jax
import jax.numpy as jnp
from jax.experimental import pallas as pl
from jax.experimental.pallas import tpu as pltpu


def _pick_tile_hw(hw, c, target=2048, vmem_budget_bytes=8 * 1024 * 1024):
    """Largest 128-aligned spatial tile whose double-buffered blocks fit VMEM.

    Per grid step: 2 inputs * 2 buffers * (1 * c * tile * 4 B).  The budget is
    kept well under the smallest default scoped-VMEM limit across generations
    (16 MiB v5e, 32 MiB v6e/v7x default, 64 MiB physical on v7x).
    """
    cap = vmem_budget_bytes // (2 * 2 * c * 4)
    cap = max(128, (cap // 128) * 128)
    tile = min(target, cap)
    if hw <= tile:
        return hw
    return tile


def _se_reweigh_kernel(inv_temp_ref, rgb_ref, depth_ref, w1t_ref, b1t_ref,
                       w2_ref, b2_ref, g_ref, out_ref,
                       acc_rgb_ref, acc_dep_ref,
                       *, hw_total, tile_hw, needs_mask):
    # inv_temp_ref: (1, 1) f32 in SMEM  -- 1 / temp
    # rgb_ref/depth_ref: (1, C, TILE_HW) spatial tile of one batch element
    # w1t_ref: (Cr, 2C)  b1t_ref: (Cr, 1)   -- SE fc1 (1x1 conv), transposed
    # w2_ref : (Cr, 1)   b2_ref : (1, 1)    -- SE fc2 (1x1 conv) -> scalar
    # g_ref  : (1, 1, 2) Gumbel(0,1) noise for this batch element
    # out_ref: (1, 1, 2) soft gumbel-softmax weights
    # acc_*  : (1, C) f32 running channel sums (per-core scratch)
    k = pl.program_id(1)
    nk = pl.num_programs(1)

    @pl.when(k == 0)
    def _init():
        acc_rgb_ref[...] = jnp.zeros_like(acc_rgb_ref)
        acc_dep_ref[...] = jnp.zeros_like(acc_dep_ref)

    rgb = rgb_ref[...].astype(jnp.float32)      # (1, C, tile)
    dep = depth_ref[...].astype(jnp.float32)
    if needs_mask:
        # Static flag: only compiled in when HW % TILE_HW != 0, so the common
        # (divisible) case pays no extra VPU work in the mem-bound loop.
        lane = jax.lax.broadcasted_iota(jnp.int32, rgb.shape, dimension=2)
        valid = (k * tile_hw + lane) < hw_total
        rgb = jnp.where(valid, rgb, 0.0)
        dep = jnp.where(valid, dep, 0.0)

    # --- Squeeze: accumulate partial spatial sums per channel ----------------
    acc_rgb_ref[...] += jnp.sum(rgb, axis=-1)   # (1, C)
    acc_dep_ref[...] += jnp.sum(dep, axis=-1)   # (1, C)

    # --- Epilogue: runs once, after the last spatial tile --------------------
    @pl.when(k == nk - 1)
    def _epilogue():
        inv_hw = 1.0 / float(hw_total)
        # concat([rgb, depth], dim=1) pooled means, channel order preserved.
        pooled = jnp.concatenate(
            [acc_rgb_ref[...], acc_dep_ref[...]], axis=-1) * inv_hw        # (1, 2C)

        # Excite: 1x1 conv -> ReLU -> 1x1 conv, done on the VPU as
        # broadcast-multiply + reductions (degenerate matmuls would only pad
        # onto the MXU).
        w1t = w1t_ref[...].astype(jnp.float32)                             # (Cr, 2C)
        h = jnp.sum(pooled * w1t, axis=-1, keepdims=True)                  # (Cr, 1)
        h = jnp.maximum(h + b1t_ref[...].astype(jnp.float32), 0.0)         # (Cr, 1)
        w_raw = jnp.sum(h * w2_ref[...].astype(jnp.float32),
                        axis=0, keepdims=True)                             # (1, 1)
        w_raw = w_raw + b2_ref[...].astype(jnp.float32)

        # self.act = Sigmoid, with the divide on the EUP.
        w = pl.reciprocal(1.0 + jnp.exp(-w_raw), approx=True)              # (1, 1)

        # stack([w, 1-w], dim=1) / temp, add gumbel noise, softmax over dim=-1
        logits = jnp.concatenate([w, 1.0 - w], axis=-1) * inv_temp_ref[0, 0]  # (1, 2)
        y = logits + g_ref[0].astype(jnp.float32)                          # (1, 2)
        y = y - jnp.max(y, axis=-1, keepdims=True)
        e = jnp.exp(y)
        sm = e * pl.reciprocal(jnp.sum(e, axis=-1, keepdims=True), approx=True)
        out_ref[0] = sm.astype(out_ref.dtype)


def squeeze_and_excite_reweigh(rgb, depth, params, gumbel_noise, temp, *, tile_hw=None):
    """Default-path forward of SqueezeAndExciteReweigh.

    rgb, depth: (B, C, H, W) float32 (NCHW, like the PyTorch module).
    params: (w1 (2C, Cr), b1 (1, Cr), w2 (Cr, 1), b2 (1, 1)).
    gumbel_noise: (B, 2) precomputed Gumbel(0,1) samples.
    temp: python float or jnp scalar (passed to the kernel via SMEM).
    Returns (B, 2, 1, 1) soft fusion weights.
    """
    B, C, H, W = rgb.shape
    HW = H * W
    C2 = 2 * C
    w1, b1, w2, b2 = params
    Cr = w1.shape[1]

    if tile_hw is None:
        tile_hw = _pick_tile_hw(HW, C)
    tile_hw = min(int(tile_hw), HW)
    if tile_hw < HW:
        tile_hw = max(128, (tile_hw // 128) * 128)   # lane-tile alignment
    num_k = pl.cdiv(HW, tile_hw)
    needs_mask = (HW % tile_hw) != 0

    # Layout plumbing only: free views / tiny weight transposes, no activation
    # copies (the old jnp.concatenate([rgb, depth]) HBM copy is gone).
    rgb3 = rgb.reshape(B, C, HW)
    depth3 = depth.reshape(B, C, HW)
    w1t = w1.T                                       # (Cr, 2C)
    b1t = b1.T                                       # (Cr, 1)
    g3 = gumbel_noise.reshape(B, 1, 2)
    inv_temp = (1.0 / jnp.asarray(temp, jnp.float32)).reshape(1, 1)

    kernel = functools.partial(_se_reweigh_kernel, hw_total=HW,
                               tile_hw=tile_hw, needs_mask=needs_mask)

    w_norm = pl.pallas_call(
        kernel,
        out_shape=jax.ShapeDtypeStruct((B, 1, 2), jnp.float32),
        grid=(B, num_k),
        in_specs=[
            pl.BlockSpec(memory_space=pltpu.MemorySpace.SMEM),        # 1/temp
            pl.BlockSpec((1, C, tile_hw), lambda b, k: (b, 0, k)),    # rgb tile
            pl.BlockSpec((1, C, tile_hw), lambda b, k: (b, 0, k)),    # depth tile
            pl.BlockSpec((Cr, C2), lambda b, k: (0, 0)),              # w1^T
            pl.BlockSpec((Cr, 1), lambda b, k: (0, 0)),               # b1^T
            pl.BlockSpec((Cr, 1), lambda b, k: (0, 0)),               # w2
            pl.BlockSpec((1, 1), lambda b, k: (0, 0)),                # b2
            pl.BlockSpec((1, 1, 2), lambda b, k: (b, 0, 0)),          # gumbel noise
        ],
        out_specs=pl.BlockSpec((1, 1, 2), lambda b, k: (b, 0, 0)),
        scratch_shapes=[
            pltpu.VMEM((1, C), jnp.float32),    # running rgb channel sums
            pltpu.VMEM((1, C), jnp.float32),    # running depth channel sums
        ],
        compiler_params=pltpu.CompilerParams(
            dimension_semantics=("parallel", "arbitrary")),
    )(inv_temp, rgb3, depth3, w1t, b1t, w2, b2, g3)

    return w_norm.reshape(B, 2, 1, 1)


def _reference(rgb, depth, params, gumbel_noise, temp):
    """Pure-JAX reference matching the PyTorch default forward path."""
    w1, b1, w2, b2 = params
    x = jnp.concatenate([rgb, depth], axis=1)
    pooled = jnp.mean(x, axis=(2, 3))                     # adaptive_avg_pool2d(x, 1)
    h = jax.nn.relu(pooled @ w1 + b1)                     # SE fc1 + ReLU
    w = jax.nn.sigmoid(h @ w2 + b2)                       # SE fc2 + Sigmoid, (B, 1)
    logits = jnp.concatenate([w, 1.0 - w], axis=-1) / temp
    out = jax.nn.softmax(logits + gumbel_noise, axis=-1)  # gumbel_softmax, hard=False
    return out.reshape(-1, 2, 1, 1)


if __name__ == "__main__":
    key = jax.random.PRNGKey(0)
    B, C, H, W = 2, 16, 32, 32        # channels_in = 16 -> concat channels = 32
    temp = 0.67
    reduction = 16                    # SqueezeAndExcitationWeight default
    C2 = 2 * C
    Cr = max(C2 // reduction, 1)      # = 2

    k_rgb, k_depth, k_w1, k_b1, k_w2, k_b2, k_g = jax.random.split(key, 7)
    rgb = jax.random.normal(k_rgb, (B, C, H, W), jnp.float32)
    depth = jax.random.normal(k_depth, (B, C, H, W), jnp.float32)

    # Deterministic synthetic SE parameters (Conv2d 1x1 weights stored as (in, out)).
    w1 = 0.1 * jax.random.normal(k_w1, (C2, Cr), jnp.float32)
    b1 = 0.1 * jax.random.normal(k_b1, (1, Cr), jnp.float32)
    w2 = 0.1 * jax.random.normal(k_w2, (Cr, 1), jnp.float32)
    b2 = 0.1 * jax.random.normal(k_b2, (1, 1), jnp.float32)
    params = (w1, b1, w2, b2)

    # Deterministic Gumbel(0,1) noise (what F.gumbel_softmax samples internally).
    u = jax.random.uniform(k_g, (B, 2), jnp.float32, minval=1e-6, maxval=1.0 - 1e-6)
    gumbel_noise = -jnp.log(-jnp.log(u))

    # tile_hw=512 forces 2 spatial tiles per batch element so the pipelined
    # accumulator path is exercised; production sizes use the auto-picked tile.
    out = squeeze_and_excite_reweigh(rgb, depth, params, gumbel_noise, temp,
                                     tile_hw=512)
    out = jax.block_until_ready(out)

    ref = _reference(rgb, depth, params, gumbel_noise, temp)
    assert out.shape == (B, 2, 1, 1), out.shape
    # Tolerance accounts for the EUP approx-reciprocal in sigmoid/softmax.
    assert jnp.allclose(out, ref, rtol=5e-3, atol=5e-3), (out, ref)
    # Each sample's two weights sum to 1 (softmax over branch dim).
    assert jnp.allclose(out.sum(axis=1), jnp.ones((B, 1, 1)), atol=5e-3)

    print("KERNEL_OK")
</pallas_src>

<mosaic_0001>
module attributes {stable_mosaic.version = 11 : i64} {
  func.func @_se_reweigh_kernel(%arg0: i32, %arg1: i32, %arg2: memref<1x1xf32, #tpu.memory_space<smem>>, %arg3: memref<1x16x512xf32, #tpu.memory_space<vmem>>, %arg4: memref<1x16x512xf32, #tpu.memory_space<vmem>>, %arg5: memref<2x32xf32, #tpu.memory_space<vmem>>, %arg6: memref<2x1xf32, #tpu.memory_space<vmem>>, %arg7: memref<2x1xf32, #tpu.memory_space<vmem>>, %arg8: memref<1x1xf32, #tpu.memory_space<vmem>>, %arg9: memref<1x1x2xf32, #tpu.memory_space<vmem>>, %arg10: memref<1x1x2xf32, #tpu.memory_space<vmem>>, %arg11: memref<1x16xf32, #tpu.memory_space<vmem>>, %arg12: memref<1x16xf32, #tpu.memory_space<vmem>>) attributes {dimension_semantics = [#tpu.dimension_semantics<parallel>, #tpu.dimension_semantics<arbitrary>], iteration_bounds = array<i64: 2, 2>, scalar_prefetch = 0 : i64, scratch_operands = 2 : i64, tpu.core_type = #tpu.core_type<tc>, window_params = [{transform_indices = @transform_0, window_bounds = array<i64: 1, 1>}, {transform_indices = @transform_1, window_bounds = array<i64: 1, 16, 512>}, {transform_indices = @transform_2, window_bounds = array<i64: 1, 16, 512>}, {pipeline_mode = #tpu.pipeline_mode<synchronous>, transform_indices = @transform_3, window_bounds = array<i64: 2, 32>}, {pipeline_mode = #tpu.pipeline_mode<synchronous>, transform_indices = @transform_4, window_bounds = array<i64: 2, 1>}, {pipeline_mode = #tpu.pipeline_mode<synchronous>, transform_indices = @transform_5, window_bounds = array<i64: 2, 1>}, {pipeline_mode = #tpu.pipeline_mode<synchronous>, transform_indices = @transform_6, window_bounds = array<i64: 1, 1>}, {transform_indices = @transform_7, window_bounds = array<i64: 1, 1, 2>}, {transform_indices = @transform_8, window_bounds = array<i64: 1, 1, 2>}]} {
    %c0_i32 = arith.constant 0 : i32
    %0 = arith.cmpi eq, %arg1, %c0_i32 : i32
    %1 = arith.extui %0 : i1 to i32
    %c0_i32_0 = arith.constant 0 : i32
    %2 = arith.cmpi ne, %1, %c0_i32_0 : i32
    scf.if %2 {
      %cst_16 = arith.constant 0.000000e+00 : f32
      %16 = vector.broadcast %cst_16 : f32 to vector<1x16xf32>
      %c0_17 = arith.constant 0 : index
      %c0_18 = arith.constant 0 : index
      %17 = vector.load %arg11[%c0_17, %c0_18] : memref<1x16xf32, #tpu.memory_space<vmem>>, vector<1x16xf32>
      tpu.vector_store %arg11[%c0_17, %c0_18], %16 {strides = array<i32>} : memref<1x16xf32, #tpu.memory_space<vmem>>, vector<1x16xf32>,
      %cst_19 = arith.constant 0.000000e+00 : f32
      %18 = vector.broadcast %cst_19 : f32 to vector<1x16xf32>
      %c0_20 = arith.constant 0 : index
      %c0_21 = arith.constant 0 : index
      %19 = vector.load %arg12[%c0_20, %c0_21] : memref<1x16xf32, #tpu.memory_space<vmem>>, vector<1x16xf32>
      tpu.vector_store %arg12[%c0_20, %c0_21], %18 {strides = array<i32>} : memref<1x16xf32, #tpu.memory_space<vmem>>, vector<1x16xf32>,
    } else {
    }
    %c0 = arith.constant 0 : index
    %c0_1 = arith.constant 0 : index
    %c0_2 = arith.constant 0 : index
    %3 = vector.load %arg3[%c0, %c0_1, %c0_2] : memref<1x16x512xf32, #tpu.memory_space<vmem>>, vector<1x16x512xf32>
    %c0_3 = arith.constant 0 : index
    %c0_4 = arith.constant 0 : index
    %c0_5 = arith.constant 0 : index
    %4 = vector.load %arg4[%c0_3, %c0_4, %c0_5] : memref<1x16x512xf32, #tpu.memory_space<vmem>>, vector<1x16x512xf32>
    %c0_6 = arith.constant 0 : index
    %c0_7 = arith.constant 0 : index
    %5 = vector.load %arg11[%c0_6, %c0_7] : memref<1x16xf32, #tpu.memory_space<vmem>>, vector<1x16xf32>
    %cst = arith.constant dense<0.000000e+00> : vector<1x16xf32>
    %6 = vector.multi_reduction <add>, %3, %cst [2] : vector<1x16x512xf32> to vector<1x16xf32>
    %7 = arith.addf %5, %6 : vector<1x16xf32>
    %c0_8 = arith.constant 0 : index
    %c0_9 = arith.constant 0 : index
    %8 = vector.load %arg11[%c0_8, %c0_9] : memref<1x16xf32, #tpu.memory_space<vmem>>, vector<1x16xf32>
    tpu.vector_store %arg11[%c0_8, %c0_9], %7 {strides = array<i32>} : memref<1x16xf32, #tpu.memory_space<vmem>>, vector<1x16xf32>,
    %c0_10 = arith.constant 0 : index
    %c0_11 = arith.constant 0 : index
    %9 = vector.load %arg12[%c0_10, %c0_11] : memref<1x16xf32, #tpu.memory_space<vmem>>, vector<1x16xf32>
    %cst_12 = arith.constant dense<0.000000e+00> : vector<1x16xf32>
    %10 = vector.multi_reduction <add>, %4, %cst_12 [2] : vector<1x16x512xf32> to vector<1x16xf32>
    %11 = arith.addf %9, %10 : vector<1x16xf32>
    %c0_13 = arith.constant 0 : index
    %c0_14 = arith.constant 0 : index
    %12 = vector.load %arg12[%c0_13, %c0_14] : memref<1x16xf32, #tpu.memory_space<vmem>>, vector<1x16xf32>
    tpu.vector_store %arg12[%c0_13, %c0_14], %11 {strides = array<i32>} : memref<1x16xf32, #tpu.memory_space<vmem>>, vector<1x16xf32>,
    %c1_i32 = arith.constant 1 : i32
    %13 = arith.cmpi eq, %arg1, %c1_i32 : i32
    %14 = arith.extui %13 : i1 to i32
    %c0_i32_15 = arith.constant 0 : i32
    %15 = arith.cmpi ne, %14, %c0_i32_15 : i32
    scf.if %15 {
      %c0_16 = arith.constant 0 : index
      %c0_17 = arith.constant 0 : index
      %16 = vector.load %arg11[%c0_16, %c0_17] : memref<1x16xf32, #tpu.memory_space<vmem>>, vector<1x16xf32>
      %c0_18 = arith.constant 0 : index
      %c0_19 = arith.constant 0 : index
      %17 = vector.load %arg12[%c0_18, %c0_19] : memref<1x16xf32, #tpu.memory_space<vmem>>, vector<1x16xf32>
      %18 = tpu.concatenate %16, %17 in 1 : vector<1x16xf32>, vector<1x16xf32> -> vector<1x32xf32>
      %cst_20 = arith.constant 9.765625E-4 : f32
      %19 = vector.broadcast %cst_20 : f32 to vector<1x32xf32>
      %20 = arith.mulf %18, %19 : vector<1x32xf32>
      %c0_21 = arith.constant 0 : index
      %c0_22 = arith.constant 0 : index
      %21 = vector.load %arg5[%c0_21, %c0_22] : memref<2x32xf32, #tpu.memory_space<vmem>>, vector<2x32xf32>
      %22 = vector.broadcast %20 : vector<1x32xf32> to vector<2x32xf32>
      %23 = arith.mulf %22, %21 : vector<2x32xf32>
      %cst_23 = arith.constant dense<0.000000e+00> : vector<2xf32>
      %24 = vector.multi_reduction <add>, %23, %cst_23 [1] : vector<2x32xf32> to vector<2xf32>
      %25 = vector.shape_cast %24 : vector<2xf32> to vector<2x1xf32>
      %c0_24 = arith.constant 0 : index
      %c0_25 = arith.constant 0 : index
      %26 = vector.load %arg6[%c0_24, %c0_25] : memref<2x1xf32, #tpu.memory_space<vmem>>, vector<2x1xf32>
      %27 = arith.addf %25, %26 : vector<2x1xf32>
      %cst_26 = arith.constant 0.000000e+00 : f32
      %28 = vector.broadcast %cst_26 : f32 to vector<2x1xf32>
      %29 = arith.maximumf %27, %28 : vector<2x1xf32>
      %c0_27 = arith.constant 0 : index
      %c0_28 = arith.constant 0 : index
      %30 = vector.load %arg7[%c0_27, %c0_28] : memref<2x1xf32, #tpu.memory_space<vmem>>, vector<2x1xf32>
      %31 = arith.mulf %29, %30 : vector<2x1xf32>
      %cst_29 = arith.constant dense<0.000000e+00> : vector<1xf32>
      %32 = vector.multi_reduction <add>, %31, %cst_29 [0] : vector<2x1xf32> to vector<1xf32>
      %33 = vector.shape_cast %32 : vector<1xf32> to vector<1x1xf32>
      %c0_30 = arith.constant 0 : index
      %c0_31 = arith.constant 0 : index
      %34 = vector.load %arg8[%c0_30, %c0_31] : memref<1x1xf32, #tpu.memory_space<vmem>>, vector<1x1xf32>
      %35 = arith.addf %33, %34 : vector<1x1xf32>
      %cst_32 = arith.constant 0.000000e+00 : f32
      %36 = vector.broadcast %cst_32 : f32 to vector<1x1xf32>
      %37 = arith.subf %36, %35 : vector<1x1xf32>
      %38 = math.exp %37 : vector<1x1xf32>
      %cst_33 = arith.constant 1.000000e+00 : f32
      %39 = vector.broadcast %cst_33 : f32 to vector<1x1xf32>
      %40 = arith.addf %39, %38 : vector<1x1xf32>
      %41 = tpu.reciprocal %40 {approx = true} : vector<1x1xf32> -> vector<1x1xf32>
      %cst_34 = arith.constant 1.000000e+00 : f32
      %42 = vector.broadcast %cst_34 : f32 to vector<1x1xf32>
      %43 = arith.subf %42, %41 : vector<1x1xf32>
      %44 = tpu.concatenate %41, %43 in 1 : vector<1x1xf32>, vector<1x1xf32> -> vector<1x2xf32>
      %c0_35 = arith.constant 0 : index
      %c0_36 = arith.constant 0 : index
      %45 = memref.load %arg2[%c0_35, %c0_36] : memref<1x1xf32, #tpu.memory_space<smem>>
      %46 = vector.broadcast %45 : f32 to vector<1x2xf32>
      %47 = arith.mulf %44, %46 : vector<1x2xf32>
      %c0_37 = arith.constant 0 : index
      %c0_38 = arith.constant 0 : index
      %c0_39 = arith.constant 0 : index
      %48 = vector.load %arg9[%c0_37, %c0_38, %c0_39] : memref<1x1x2xf32, #tpu.memory_space<vmem>>, vector<1x1x2xf32>
      %49 = vector.shape_cast %48 : vector<1x1x2xf32> to vector<1x2xf32>
      %50 = arith.addf %47, %49 : vector<1x2xf32>
      %cst_40 = arith.constant dense<0xFF800000> : vector<1xf32>
      %51 = vector.multi_reduction <maximumf>, %50, %cst_40 [1] : vector<1x2xf32> to vector<1xf32>
      %52 = vector.shape_cast %51 : vector<1xf32> to vector<1x1xf32>
      %53 = vector.broadcast %52 : vector<1x1xf32> to vector<1x2xf32>
      %54 = arith.subf %50, %53 : vector<1x2xf32>
      %55 = math.exp %54 : vector<1x2xf32>
      %cst_41 = arith.constant dense<0.000000e+00> : vector<1xf32>
      %56 = vector.multi_reduction <add>, %55, %cst_41 [1] : vector<1x2xf32> to vector<1xf32>
      %57 = vector.shape_cast %56 : vector<1xf32> to vector<1x1xf32>
      %58 = tpu.reciprocal %57 {approx = true} : vector<1x1xf32> -> vector<1x1xf32>
      %59 = vector.broadcast %58 : vector<1x1xf32> to vector<1x2xf32>
      %60 = arith.mulf %55, %59 : vector<1x2xf32>
      %c0_42 = arith.constant 0 : index
      %c0_43 = arith.constant 0 : index
      %c0_44 = arith.constant 0 : index
      %61 = vector.load %arg10[%c0_42, %c0_43, %c0_44] : memref<1x1x2xf32, #tpu.memory_space<vmem>>, vector<1x1x2xf32>
      %62 = vector.shape_cast %61 : vector<1x1x2xf32> to vector<1x2xf32>
      %63 = vector.shape_cast %60 : vector<1x2xf32> to vector<1x1x2xf32>
      tpu.vector_store %arg10[%c0_42, %c0_43, %c0_44], %63 {strides = array<i32>} : memref<1x1x2xf32, #tpu.memory_space<vmem>>, vector<1x1x2xf32>,
    } else {
    }
    return
  }
  func.func @transform_0(%arg0: i32, %arg1: i32) -> (i32, i32) {
    %c0_i32 = arith.constant 0 : i32
    %c0_i32_0 = arith.constant 0 : i32
    %c0_i32_1 = arith.constant 0 : i32
    return %c0_i32, %c0_i32_0 : i32, i32
  }
  func.func @transform_1(%arg0: i32, %arg1: i32) -> (i32, i32, i32) {
    %c0_i32 = arith.constant 0 : i32
    %c0_i32_0 = arith.constant 0 : i32
    return %arg0, %c0_i32, %arg1 : i32, i32, i32
  }
  func.func @transform_2(%arg0: i32, %arg1: i32) -> (i32, i32, i32) {
    %c0_i32 = arith.constant 0 : i32
    %c0_i32_0 = arith.constant 0 : i32
    return %arg0, %c0_i32, %arg1 : i32, i32, i32
  }
  func.func @transform_3(%arg0: i32, %arg1: i32) -> (i32, i32) {
    %c0_i32 = arith.constant 0 : i32
    %c0_i32_0 = arith.constant 0 : i32
    %c0_i32_1 = arith.constant 0 : i32
    return %c0_i32, %c0_i32_0 : i32, i32
  }
  func.func @transform_4(%arg0: i32, %arg1: i32) -> (i32, i32) {
    %c0_i32 = arith.constant 0 : i32
    %c0_i32_0 = arith.constant 0 : i32
    %c0_i32_1 = arith.constant 0 : i32
    return %c0_i32, %c0_i32_0 : i32, i32
  }
  func.func @transform_5(%arg0: i32, %arg1: i32) -> (i32, i32) {
    %c0_i32 = arith.constant 0 : i32
    %c0_i32_0 = arith.constant 0 : i32
    %c0_i32_1 = arith.constant 0 : i32
    return %c0_i32, %c0_i32_0 : i32, i32
  }
  func.func @transform_6(%arg0: i32, %arg1: i32) -> (i32, i32) {
    %c0_i32 = arith.constant 0 : i32
    %c0_i32_0 = arith.constant 0 : i32
    %c0_i32_1 = arith.constant 0 : i32
    return %c0_i32, %c0_i32_0 : i32, i32
  }
  func.func @transform_7(%arg0: i32, %arg1: i32) -> (i32, i32, i32) {
    %c0_i32 = arith.constant 0 : i32
    %c0_i32_0 = arith.constant 0 : i32
    %c0_i32_1 = arith.constant 0 : i32
    return %arg0, %c0_i32, %c0_i32_0 : i32, i32, i32
  }
  func.func @transform_8(%arg0: i32, %arg1: i32) -> (i32, i32, i32) {
    %c0_i32 = arith.constant 0 : i32
    %c0_i32_0 = arith.constant 0 : i32
    %c0_i32_1 = arith.constant 0 : i32
    return %arg0, %c0_i32, %c0_i32_0 : i32, i32, i32
  }
}

</mosaic_0001>

<bundles_post_ra>
// kernel: tpu_custom_call.1
= control target key start
LH: loop header
LB: loop body
LE: loop exit
PB: predicated region body
PF: predicated region fallthrough
CT: control target
= control target key end

     0   :  { %s1852_s0 = inlined_call_operand.<no memory space> [shape: f32[1,1], index: 0, kind: input, shape index: {}]   ;;  %s1853_s1 = inlined_call_operand.hbm [shape: f32[2,16,1024], index: 1, kind: input, shape index: {}]   ;;  %s1854_s2 = inlined_call_operand.hbm [shape: f32[2,16,1024], index: 2, kind: input, shape index: {}]   ;;  %s1855_s3 = inlined_call_operand.vmem [shape: f32[2,32], index: 3, kind: input, shape index: {}]   ;;  %s1856_s4 = inlined_call_operand.vmem [shape: f32[2,1], index: 4, kind: input, shape index: {}]   ;;  %s1857_s5 = inlined_call_operand.vmem [shape: f32[2,1], index: 5, kind: input, shape index: {}]   ;;  %s1858_s6 = inlined_call_operand.<no memory space> [shape: f32[1,1], index: 6, kind: input, shape index: {}]   ;;  %s1859_s7 = inlined_call_operand.vmem [shape: f32[2,1,2], index: 7, kind: input, shape index: {}]   ;;  %s1860_s8 = inlined_call_operand.hbm [shape: f32[2,1,2], index: 8, kind: output, shape index: {}]  }
   0x1   :  { %1872 = sst [smem:[#allocation24_spill]] %s1853_s1  ;;  %v14_v0 = vstv %s1858_s6 }
   0x2   :  { %13 = sst [smem:[#allocation4]] %s1852_s0  ;;  %15 = vst [vmem:[#allocation5] sm:$0x1] %v14_v0 }
   0x3   :  { %16 = vsyncpa [#allocation7], 0 }
   0x4   :  { %18 = vsyncpa [#allocation7 + $0x1], 0 }
   0x5   :  { %19 = vsyncpa [#allocation10], 0 }
   0x6   :  { %21 = vsyncpa [#allocation10 + $0x1], 0 }
   0x7   :  { %22 = vsyncpa [#allocation8], 0 }
   0x8   :  { %24 = vsyncpa [#allocation8 + $0x1], 0  ;;  %s1440_s9 = smov 0   ;;  %s1442_s10 = smov 0  }
   0x9   :  { %s1444_s11 = smov 0   ;;  %s1446_s12 = smov 0  }
   0xa   :  { %s1448_s0 = smov 0   ;;  %s1450_s13 = smov 0  }
   0xb   :  { %s1452_s6 = smov 0   ;;  %s1454_s14 = smov 0  }
   0xc   :  { %s1456_s15 = smov 0   ;;  %s1458_s16 = smov 0  }
   0xd   :  { %s1460_s17 = smov 0  }
   0xe LB: > { %1873 = sst [smem:[#allocation15_spill]] %s1344_s11  ;;  %s1044_s18 = sadd.s32 4294967295, %s1376_s17   ;;  %s1376_s17 = sphi %s1460_s17, %s30_s17   ;;  %s1372_s16 = sphi %s1458_s16, %s1904_s16   ;;  %s1368_s15 = sphi %s1456_s15, %s1903_s15   ;;  %s1364_s14 = sphi %s1454_s14, %s1902_s14   ;;  %s1360_s6 = sphi %s1452_s6, %s1901_s6   ;;  %s1356_s13 = sphi %s1450_s13, %s1900_s13   ;;  %s1352_s0 = sphi %s1448_s0, %s1908_s0   ;;  %s1348_s12 = sphi %s1446_s12, %s1907_s12   ;;  %s1344_s11 = sphi %s1444_s11, %s1898_s11   ;;  %s1340_s10 = sphi %s1442_s10, %s1906_s10   ;;  %s1336_s9 = sphi %s1440_s9, %s1905_s9  }
   0xf   : > { %1874 = sst [smem:[#allocation16_spill]] %s1356_s13  ;;  %s1045_s19 = sadd.s32 4294967294, %s1376_s17  }
  0x10   : > { %1875 = sst [smem:[#allocation17_spill]] %s1368_s15  ;;  %s39_s20 = sadd.s32 1, %s1368_s15 }
  0x11   : > { %1876 = sst [smem:[#allocation18_spill]] %s1372_s16  ;;  %s42_s21 = sadd.s32 1, %s1372_s16 }
  0x12   : > { %p40_p0 = scmp.ge.s32.totalorder %s39_s20, 2  ;;  %s72_s22 = sadd.s32 1, %s1356_s13 }
  0x13   : > { %p79_p1 = scmp.ne.s32.totalorder %s1356_s13, %s1352_s0  ;;  %p80_p2 = scmp.eq.s32.totalorder %s1376_s17, 0 }
  0x14   : > { %s1910_s20 = smov (%p40_p0, %s39_s20), 0  ;;  %s1912_s21 = smov (!%p40_p0, %s42_s21), %s1372_s16 }
  0x15   : > { %1877 = sst [smem:[#allocation19_spill]] %s1910_s20  ;;  %s68_s23 = ssub.s32 %s1368_s15, %s1910_s20 }
  0x16   : > { %p1506_p3 = por %p80_p2, %p79_p1  ;;  %p44_p4 = scmp.ge.s32.totalorder %s1912_s21, 2 }
  0x17   : > { %p85_p5 = scmp.ne.s32.totalorder %s1352_s0, %s1348_s12  ;;  %p86_p6 = scmp.eq.s32.totalorder %s1044_s18, 0 }
  0x18   : > { %s236_s25 = sadd.s32 1, %s1344_s11  ;;  %s1914_s21 = smov (%p44_p4, %s1912_s21), 0 }
  0x19   : > { %1879 = sst [smem:[#allocation20_spill]] %s1914_s21  ;;  %p1514_p7 = por %p86_p6, %p85_p5 }
  0x1a   : > { %p246_p8 = scmp.ne.s32.totalorder %s1344_s11, %s1340_s10  ;;  %s67_s27 = ssub.s32 %s1372_s16, %s1914_s21 }
  0x1b   : > { %s1880_s26 = scalar_select %p1514_p7, 1, 0 }
  0x1c   : > { %p247_p9 = scmp.eq.s32.totalorder %s1044_s18, 3  ;;  %s69_s28 = sor.u32 %s68_s23, %s67_s27 }
  0x1d   : > { %p234_p10 = scmp.eq.s32.totalorder %s67_s27, 0  ;;  %p70_p11 = scmp.eq.s32.totalorder %s69_s28, 0 }
  0x1e   : > { %p1522_p12 = por %p247_p9, %p246_p8  ;;  %p252_p13 = scmp.ne.s32.totalorder %s1340_s10, %s1336_s9 }
  0x1f   : > { %s1527_s30 = scalar_select %p234_p10, %s1344_s11, %s236_s25  }
  0x20   : > { %s1881_s29 = scalar_select %p1522_p12, 1, 0 }
  0x21   : > { %1882 = sst [smem:[#allocation21_spill]] %s1527_s30  ;;  %p253_p0 = scmp.eq.s32.totalorder %s1045_s19, 3 }
  0x22   : > { %s1530_s12 = scalar_select %p70_p11, %s1356_s13, %s72_s22  }
  0x23   : > { %p1082_p1 = scmp.lt.s32.totalorder %s1376_s17, 4  ;;  %p1535_p2 = por %p253_p0, %p252_p13 }
  0x24   : > { %1883 = sst [smem:[#allocation22_spill]] %s1530_s12  ;;  %s1540_s18 = sand.u32 1, %s1356_s13  }
  0x25   : > { %s1884_s20 = scalar_select %p1535_p2, 1, 0 }
  0x26   : > { %s1864_s23 = sshll.u32 %s1540_s18, 6  ;;  %s1049_s27 = sshll.u32 %s1368_s15, 2 }
  0x27   : > { %1885 = sst [smem:[#allocation23_spill]] %s1884_s20  ;;  %s1050_s28 = sshll.u32 %s1372_s16, 4 }
  0x28   : > { %s292_s25 = scalar_lea.vmem [#allocation6], %s1864_s23  ;;  %s1547_s21 = sadd.s32 %s1050_s28, %s1049_s27 }
  0x29   : > { %s301_s22 = sshll.u32 %s292_s25, 4  ;;  %s1865_s19 = sshll.u32 %s1547_s21, 7  ;;  %s1549_s22 = int_to_ptr.vmem [resolvable:$true] %s301_s22 }
  0x2a   : > { %p1554_p4 = pnand %p1082_p1, %p1506_p3  ;;  %s1887_s1 = sld [smem:[#allocation24_spill]] }
  0x2c   : > { %p1192_p3 = pneg %p1554_p4 }
  0x30   : > { %s1563_s23 = scalar_lea.hbm %s1887_s1, %s1865_s19  ;;  %s1195_s30 = scalar_lea.hbm %s1887_s1, 4096 }
  0x31   : > { %s1190_s28 = scalar_lea.hbm %s1563_s23, 1024  ;;  %p1196_p10 = scmp.lt.u32.totalorder %s1563_s23, %s1887_s1 }
  0x32   : > { %p1191_p6 = scmp.ne.s32.totalorder %s1563_s23, %s1190_s28  ;;  %p1197_p11 = scmp.lt.u32.totalorder %s1195_s30, %s1190_s28 }
  0x33   : > { %p1199_p0 = scmp.lt.u32.totalorder %s1190_s28, %s1563_s23 }
  0x34   : > { %p1193_p8 = pnand %p1192_p3, %p1191_p6  ;;  %p1198_p13 = por %p1197_p11, %p1196_p10 }
  0x36   : > { %p1194_p9 = pneg %p1193_p8  ;;  %p1200_p1 = por %p1199_p0, %p1198_p13 }
  0x38   : > { %p1201_p5 = pnand %p1200_p1, %p1194_p9 }
  0x3a   : > { %1204 = shalt.err (!%p1201_p5)
}
  0x3b   : > { %s1205_s27 = scalar_lea.vmem %s1549_s22, 1024  ;;  %s1378_s24 = smov [#allocation6]  }
  0x3c   : > { %p1206_p6 = scmp.ne.s32.totalorder %s1549_s22, %s1205_s27  ;;  %s1210_s13 = sshll.u32 %s1378_s24, 4  ;;  %s1211_s13 = int_to_ptr.vmem [resolvable:$false] %s1210_s13 }
  0x3d   : > { %s1212_s19 = scalar_lea.vmem %s1211_s13, 2048  ;;  %p1213_p12 = scmp.lt.s32.totalorder %s1549_s22, %s1211_s13 }
  0x3e   : > { %p1208_p8 = pnand %p1206_p6, %p1192_p3  ;;  %p1214_p10 = scmp.lt.s32.totalorder %s1212_s19, %s1205_s27 }
  0x40   : > { %p1209_p2 = pneg %p1208_p8  ;;  %p1215_p11 = por %p1214_p10, %p1213_p12 }
  0x42   : > { %p1216_p13 = pnand %p1215_p11, %p1209_p2 }
  0x44   : > { %1219 = shalt.err (!%p1216_p13)
}
  0x45   : > { %s1379_s28 = smov 1024   ;;  %s1380_s30 = smov 512  }
  0x46   : > { %s1381_s25 = smov 32   ;;  %s1888_s27 = scalar_lea.sflag [#allocation7], %s1540_s18 }
  0x47   : > { %1074 = dma.hbm_to_vmem [thread:$0]  (!%p1554_p4), %s1563_s23, 1024, %s1549_s22, %s1888_s27, %s1379_s28, %s1380_s30, %s1381_s25  }
  0x48   : > { %p338_p12 = scmp.lt.s32.totalorder %s1376_s17, 5  ;;  %s1889_s24 = sshll.u32 %s1547_s21, 7 }
  0x49   : > { %s1603_s1 = scalar_lea.hbm %s1854_s2, %s1889_s24  ;;  %p1890_p2 = scmp.ge.s32.totalorder %s1376_s17, 1 }
  0x4a   : > { %s1892_s15 = sshll.u32 %s1540_s18, 6  ;;  %s312_s21 = scalar_lea.sflag [#allocation10], %s1540_s18 }
  0x4b   : > { %p1607_p5 = pnand %p1890_p2, %p338_p12  ;;  %s315_s11 = scalar_lea.vmem [#allocation9], %s1892_s15 }
  0x4c   : > { %s324_s20 = sshll.u32 %s315_s11, 4  ;;  %s1220_s23 = scalar_lea.hbm %s1603_s1, 1024  ;;  %s1613_s20 = int_to_ptr.vmem [resolvable:$true] %s324_s20 }
  0x4d   : > { %p1221_p9 = scmp.ne.s32.totalorder %s1603_s1, %s1220_s23  ;;  %s1225_s24 = scalar_lea.hbm %s1854_s2, 4096 }
  0x4e   : > { %p1226_p6 = scmp.lt.u32.totalorder %s1603_s1, %s1854_s2  ;;  %p1227_p8 = scmp.lt.u32.totalorder %s1225_s24, %s1220_s23 }
  0x4f   : > { %p1223_p0 = pnand %p1221_p9, %p1192_p3  ;;  %p1229_p11 = scmp.lt.u32.totalorder %s1220_s23, %s1603_s1 }
  0x50   : > { %p1228_p10 = por %p1227_p8, %p1226_p6 }
  0x51   : > { %p1224_p1 = pneg %p1223_p0 }
  0x52   : > { %p1230_p13 = por %p1229_p11, %p1228_p10 }
  0x54   : > { %p1231_p12 = pnand %p1230_p13, %p1224_p1 }
  0x56   : > { %1234 = shalt.err (!%p1231_p12)
}
  0x57   : > { %s1235_s11 = scalar_lea.vmem %s1613_s20, 1024  ;;  %s1382_s15 = smov [#allocation9]  }
  0x58   : > { %p1236_p2 = scmp.ne.s32.totalorder %s1613_s20, %s1235_s11  ;;  %s1240_s22 = sshll.u32 %s1382_s15, 4  ;;  %s1241_s22 = int_to_ptr.vmem [resolvable:$false] %s1240_s22 }
  0x59   : > { %s1242_s27 = scalar_lea.vmem %s1241_s22, 2048  ;;  %p1243_p7 = scmp.lt.s32.totalorder %s1613_s20, %s1241_s22 }
  0x5a   : > { %p1238_p9 = pnand %p1236_p2, %p1192_p3  ;;  %p1244_p6 = scmp.lt.s32.totalorder %s1242_s27, %s1235_s11 }
  0x5c   : > { %p1239_p0 = pneg %p1238_p9  ;;  %p1245_p8 = por %p1244_p6, %p1243_p7 }
  0x5e   : > { %p1246_p10 = pnand %p1245_p8, %p1239_p0 }
  0x60   : > { %1249 = shalt.err (!%p1246_p10)
}
  0x61   : > { %1077 = dma.hbm_to_vmem [thread:$0]  (!%p1554_p4), %s1603_s1, 1024, %s1613_s20, %s312_s21, %s1379_s28, %s1380_s30, %s1381_s25  }
  0x62   : > { %342 = sbr.rel (%p1607_p5) target bundleno = 1216 (0x4c0), region = 52  ;;  %s344_s23 = sand.u32 (!%p1607_p5), 1, %s1352_s0  }
  0x63   : > { %s1057_s24 = sshll.u32 (!%p1607_p5), %s344_s23, 6  ;;  %s345_s13 = scalar_lea.sflag (!%p1607_p5), [#allocation7], %s344_s23 }
  0x64   : > { %s348_s19 = scalar_lea.vmem (!%p1607_p5), [#allocation6], %s1057_s24  ;;  %p1893_p7 = scmp.ne.s32.totalorder (!%p1607_p5), %s1880_s26, 0 }
  0x69   : > { %1323 = dma.done.wait (%p1893_p7), %s345_s13, 1024  }
  0x6a   : > { %1325 = vsyncadd (%p1893_p7), %s345_s13, 4294966272  ;;  %s354_s12 = scalar_lea.sflag [#allocation10], %s344_s23  ;;  %s1651_s18 = scalar_lea.vmem [#allocation9], %s1057_s24 }
  0x6b   : > { %1327 = dma.done.wait (%p1893_p7), %s354_s12, 1024  }
  0x6c   : > { %1329 = vsyncadd (%p1893_p7), %s354_s12, 4294966272  ;;  %s395_s1 = sand.u32 1, %s1340_s10   ;;  %p399_p4 = scmp.lt.s32.totalorder %s1364_s14, 1 }
  0x6d   : > { %s1668_s25 = scalar_lea.vmem [#allocation11], %s395_s1  ;;  %p1059_p3 = scmp.ne.s32.totalorder %s1360_s6, 0 }
  0x6e   : > { %s1660_s16 = scalar_select %p399_p4, %s1364_s14, 1 }
  0x6f   : > { %405 = sbr.rel (%p1059_p3) target bundleno = 118 (0x76), region = 64  ;;  %vm406_vm0 = vcmask (!%p1059_p3), 122880   ;;  %v1383_v1 = vmov (!%p1059_p3), 0.0  }
  0x70   : > { %s401_s30 = scalar_lea.vmem %s1859_s7, %s1660_s16  ;;  %407 = vst.msk [vmem:[#allocation2] sm:$0x1] (!%p1059_p3), %vm406_vm0, %v1383_v1  ;;  %408 = vst.msk [vmem:[#allocation3] sm:$0x1] (!%p1059_p3), %vm406_vm0, %v1383_v1 }
  0x76 PF: > { %v409_v2 = vld [vmem:[%s348_s19] sm:$0xff]  ;;  %v410_v3 = vld [vmem:[%s348_s19 + $0x8] sm:$0xff]  ;;  %v411_v4 = vld [vmem:[%s348_s19 + $0x10] sm:$0xff]  ;;  %v1384_v30 = vmov 0   ;;  %v438_v31 = vlaneseq  ;;  %v1385_v32 = vmov 1966171168  }
  0x77   : > { %v426_v5 = vadd.f32 %v410_v3, %v409_v2  ;;  %v413_v6 = vld [vmem:[%s348_s19 + $0x20] sm:$0xff]  ;;  %v414_v7 = vld [vmem:[%s348_s19 + $0x28] sm:$0xff]  ;;  %v412_v8 = vld [vmem:[%s348_s19 + $0x18] sm:$0xff]  ;;  %1180 = vset.pattern.permute.xlu0 %v1384_v30  ;;  %1181 = vset.pattern.permute.xlu1 %v1384_v30  ;;  %v507_v33 = vunpack.c.l.s4 %v1385_v32  ;;  %vm617_vm1 = vcmask 130112   ;;  %vm635_vm2 = vcmask 122880   ;;  %p1060_p5 = scmp.ne.s32.totalorder %s1360_s6, 1 }
  0x78   : > { %v415_v9 = vld [vmem:[%s348_s19 + $0x30] sm:$0xff]  ;;  %v431_v10 = vadd.f32 %v414_v7, %v413_v6  ;;  %v417_v11 = vld [vmem:[%s1651_s18] sm:$0xff]  ;;  %v416_v13 = vld [vmem:[%s348_s19 + $0x38] sm:$0xff]  ;;  %v1680_v34 = vshrl.u32 %v438_v31, 7  ;;  %s1386_s26 = smov (!%p1060_p5), 16   ;;  %vm858_vm3 = vcmask (!%p1060_p5), 130048  }
  0x79   : > { %v427_v12 = vadd.f32 %v426_v5, %v411_v4  ;;  %v418_v14 = vld [vmem:[%s1651_s18 + $0x8] sm:$0xff]  ;;  %v419_v15 = vld [vmem:[%s1651_s18 + $0x10] sm:$0xff]  ;;  %v421_v18 = vld [vmem:[%s1651_s18 + $0x20] sm:$0xff]  ;;  %v508_v35 = vunpack.c.0.s8 %v507_v33  ;;  %vm867_vm4 = vcmask (!%p1060_p5), 254976   ;;  %vm876_vm5 = vcmask (!%p1060_p5), 1024   ;;  %s1387_s23 = smov (!%p1060_p5), 1  }
  0x7a   : > { %v432_v16 = vadd.f32 %v431_v10, %v415_v9  ;;  %v638_v17 = vadd.f32 %v418_v14, %v417_v11  ;;  %v422_v19 = vld [vmem:[%s1651_s18 + $0x28] sm:$0xff]  ;;  %v423_v20 = vld [vmem:[%s1651_s18 + $0x30] sm:$0xff]  ;;  %v420_v22 = vld [vmem:[%s1651_s18 + $0x18] sm:$0xff]  ;;  %v1683_v36 = vsub.s32 0, %v1680_v34  ;;  %v1686_v37 = vsub.s32 1, %v1680_v34  ;;  %s898_s24 = sld [smem:[#allocation4]] (!%p1060_p5) }
  0x7b   : > { %v428_v21 = vadd.f32 %v427_v12, %v412_v8  ;;  %v643_v23 = vadd.f32 %v422_v19, %v421_v18  ;;  %v424_v26 = vld [vmem:[%s1651_s18 + $0x38] sm:$0xff]  ;;  %v1689_v38 = vsub.s32 2, %v1680_v34  ;;  %v1692_v39 = vsub.s32 3, %v1680_v34 }
  0x7c   : > { %v639_v24 = vadd.f32 %v638_v17, %v419_v15  ;;  %v433_v25 = vadd.f32 %v432_v16, %v416_v13  ;;  %v1695_v40 = vsub.s32 4, %v1680_v34  ;;  %v1698_v41 = vsub.s32 5, %v1680_v34 }
  0x7d   : > { %429 = vadd.xlane.f32.xlu0 %v428_v21  ;;  %v644_v27 = vadd.f32 %v643_v23, %v423_v20  ;;  %v1701_v42 = vsub.s32 6, %v1680_v34  ;;  %v1704_v43 = vsub.s32 7, %v1680_v34  ;;  %v1707_v45 = vsub.s32 %v508_v35, %v1680_v34 }
  0x7e   : > { %v640_v28 = vadd.f32 %v639_v24, %v420_v22  ;;  %vm896_vm6 = vcmask (!%p1060_p5), 7168   ;;  %vm903_vm7 = vcmask (!%p1060_p5), 8192  }
  0x7f   : > { %v645_v29 = vadd.f32 %v644_v27, %v424_v26 }
  0x80   : > { %641 = vadd.xlane.f32.xlu1 %v640_v28 }
  0x81   : > { %434 = vadd.xlane.f32.xlu0 %v433_v25 }
  0x84   : > { %646 = vadd.xlane.f32.xlu1 %v645_v29 }
 0x10a   : > { %v430_v44 = vpop.xlane.xlu0 %429 }
 0x10b   : > { %v441_v46 = vrot.slane %v430_v44, %v1683_v36  ;;  %v445_v47 = vrot.slane %v430_v44, %v1686_v37  ;;  %v449_v48 = vrot.slane %v430_v44, %v1689_v38  ;;  %v453_v49 = vrot.slane %v430_v44, %v1692_v39 }
 0x10c   : > { %v457_v50 = vrot.slane %v430_v44, %v1695_v40  ;;  %v461_v51 = vrot.slane %v430_v44, %v1698_v41  ;;  %v465_v52 = vrot.slane %v430_v44, %v1701_v42  ;;  %v469_v53 = vrot.slane %v430_v44, %v1704_v43 }
 0x10d   : > { %v642_v54 = vpop.xlane.xlu1 %641  ;;  %v502_v55 = vcombine.low %v441_v46, %v445_v47  ;;  %v503_v56 = vcombine.low %v449_v48, %v453_v49 }
 0x10e   : > { %v435_v57 = vpop.xlane.xlu0 %434  ;;  %v504_v58 = vcombine.low %v457_v50, %v461_v51  ;;  %v505_v59 = vcombine.low %v465_v52, %v469_v53  ;;  %v653_v60 = vrot.slane %v642_v54, %v1683_v36  ;;  %v657_v61 = vrot.slane %v642_v54, %v1686_v37 }
 0x10f   : > { %v512_v62 = vrot.slane %v502_v55, %v1707_v45  ;;  %v519_v63 = vrot.slane %v503_v56, %v1707_v45  ;;  %v473_v0 = vrot.slane %v435_v57, %v1683_v36  ;;  %v477_v1 = vrot.slane %v435_v57, %v1686_v37 }
 0x110   : > { %v526_v2 = vrot.slane %v504_v58, %v1707_v45  ;;  %v533_v3 = vrot.slane %v505_v59, %v1707_v45  ;;  %v481_v4 = vrot.slane %v435_v57, %v1689_v38  ;;  %v485_v5 = vrot.slane %v435_v57, %v1692_v39 }
 0x111   : > { %v534_v6 = vcombine.low %v512_v62, %v519_v63  ;;  %v489_v7 = vrot.slane %v435_v57, %v1695_v40  ;;  %v493_v8 = vrot.slane %v435_v57, %v1698_v41  ;;  %v497_v9 = vrot.slane %v435_v57, %v1701_v42  ;;  %v647_v18 = vpop.xlane.xlu1 %646 }
 0x112   : > { %v535_v10 = vcombine.low %v526_v2, %v533_v3  ;;  %v501_v11 = vrot.slane %v435_v57, %v1704_v43  ;;  %v551_v12 = vcombine.low %v473_v0, %v477_v1  ;;  %v552_v13 = vcombine.low %v481_v4, %v485_v5 }
 0x113   : > { %v542_v14 = vrot.slane %v534_v6, %v1707_v45  ;;  %v553_v15 = vcombine.low %v489_v7, %v493_v8  ;;  %v661_v16 = vrot.slane %v642_v54, %v1689_v38  ;;  %v665_v17 = vrot.slane %v642_v54, %v1692_v39 }
 0x114   : > { %v549_v19 = vrot.slane %v535_v10, %v1707_v45  ;;  %v554_v20 = vcombine.low %v497_v9, %v501_v11  ;;  %v561_v21 = vrot.slane %v551_v12, %v1707_v45  ;;  %v568_v22 = vrot.slane %v552_v13, %v1707_v45 }
 0x115   : > { %v575_v23 = vrot.slane %v553_v15, %v1707_v45  ;;  %v669_v24 = vrot.slane %v642_v54, %v1695_v40  ;;  %v673_v25 = vrot.slane %v642_v54, %v1698_v41  ;;  %v677_v26 = vrot.slane %v642_v54, %v1701_v42 }
 0x116   : > { %v550_v27 = vcombine.low %v542_v14, %v549_v19  ;;  %v582_v28 = vrot.slane %v554_v20, %v1707_v45  ;;  %v583_v29 = vcombine.low %v561_v21, %v568_v22  ;;  %v681_v30 = vrot.slane %v642_v54, %v1704_v43  ;;  %v425_v20 = vld [vmem:[#allocation2] sm:$0x1] }
 0x117   : > { %v714_v32 = vcombine.low %v653_v60, %v657_v61  ;;  %v715_v33 = vcombine.low %v661_v16, %v665_v17  ;;  %v716_v35 = vcombine.low %v669_v24, %v673_v25  ;;  %v685_v44 = vrot.slane %v647_v18, %v1683_v36 }
 0x118   : > { %601 = vperm.xlu0 %1180, %v550_v27   ;;  %v584_v46 = vcombine.low %v575_v23, %v582_v28  ;;  %v591_v47 = vrot.slane %v583_v29, %v1707_v45  ;;  %v717_v48 = vcombine.low %v677_v26, %v681_v30  ;;  %v689_v49 = vrot.slane %v647_v18, %v1686_v37  ;;  %v637_v26 = vld [vmem:[#allocation3] sm:$0x1] }
 0x119   : > { %v724_v50 = vrot.slane %v714_v32, %v1707_v45  ;;  %v731_v51 = vrot.slane %v715_v33, %v1707_v45  ;;  %v738_v52 = vrot.slane %v716_v35, %v1707_v45  ;;  %v693_v53 = vrot.slane %v647_v18, %v1689_v38 }
 0x11a   : > { %v598_v54 = vrot.slane %v584_v46, %v1707_v45  ;;  %v745_v55 = vrot.slane %v717_v48, %v1707_v45  ;;  %v697_v56 = vrot.slane %v647_v18, %v1692_v39  ;;  %v701_v57 = vrot.slane %v647_v18, %v1695_v40  ;;  %v871_v48 = vld [vmem:[%s1856_s4] sm:$0x3] (!%p1060_p5) }
 0x11b   : > { %v746_v58 = vcombine.low %v724_v50, %v731_v51  ;;  %v705_v59 = vrot.slane %v647_v18, %v1698_v41  ;;  %v709_v37 = vrot.slane %v647_v18, %v1701_v42  ;;  %v713_v60 = vrot.slane %v647_v18, %v1704_v43  ;;  %v874_v51 = vld [vmem:[%s1857_s5] sm:$0x3] (!%p1060_p5) }
 0x11c   : > { %v599_v61 = vcombine.low %v591_v47, %v598_v54  ;;  %v747_v62 = vcombine.low %v738_v52, %v745_v55  ;;  %v763_v63 = vcombine.low %v685_v44, %v689_v49  ;;  %v764_v0 = vcombine.low %v693_v53, %v697_v56  ;;  %v861_v44 = vld [vmem:[%s1855_s3] sm:$0x3] (!%p1060_p5) }
 0x11d   : > { %v754_v38 = vrot.slane %v746_v58, %v1707_v45  ;;  %v765_v1 = vcombine.low %v701_v57, %v705_v59  ;;  %v766_v2 = vcombine.low %v709_v37, %v713_v60  ;;  %v607_v9 = vand.u32 127, %v438_v31  ;;  %v884_v59 = vld [vmem:[#allocation5] sm:$0x1] (!%p1060_p5) }
 0x11e   : > { %604 = vperm.xlu1 %1181, %v599_v61   ;;  %v761_v39 = vrot.slane %v747_v62, %v1707_v45  ;;  %v773_v40 = vrot.slane %v763_v63, %v1707_v45  ;;  %v780_v3 = vrot.slane %v764_v0, %v1707_v45 }
 0x11f   : > { %v787_v41 = vrot.slane %v765_v1, %v1707_v45  ;;  %v794_v42 = vrot.slane %v766_v2, %v1707_v45  ;;  %v612_v10 = vadd.s32 4294967288, %v607_v9  ;;  %v610_v11 = vsub.s32 %v607_v9, %v1680_v34 }
 0x120   : > { %v762_v43 = vcombine.low %v754_v38, %v761_v39  ;;  %v795_v4 = vcombine.low %v773_v40, %v780_v3  ;;  %v899_v2 = vstv (!%p1060_p5), %s898_s24  ;;  %v901_v3 = vld [vmem:[%s401_s30] sm:$0x1] (!%p1060_p5) }
 0x121   : > { %v796_v5 = vcombine.low %v787_v41, %v794_v42  ;;  %v615_v12 = vsub.s32 %v612_v10, %v1680_v34 }
 0x122   : > { %813 = vperm.xlu1 %1181, %v762_v43   ;;  %v803_v6 = vrot.slane %v795_v4, %v1707_v45 }
 0x123   : > { %v810_v7 = vrot.slane %v796_v5, %v1707_v45 }
 0x125   : > { %v811_v8 = vcombine.low %v803_v6, %v810_v7 }
 0x127   : > { %816 = vperm.xlu1 %1181, %v811_v8  }
 0x197   : > { %v602_v13 = vpop.permute.xlu0 %601 }
 0x198   : > { %v611_v15 = vrot.slane %v602_v13, %v610_v11 }
 0x19d   : > { %v605_v14 = vpop.permute.xlu1 %604 }
 0x19e   : > { %v616_v16 = vrot.slane %v605_v14, %v615_v12 }
 0x1a0   : > { %v618_v17 = vsel %vm617_vm1, %v616_v16, %v611_v15 }
 0x1a1   : > { %v625_v18 = vrot.slane %v618_v17, %v1707_v45  ;;  %v814_v19 = vpop.permute.xlu1 %813 }
 0x1a2   : > { %v821_v23 = vrot.slane %v814_v19, %v610_v11 }
 0x1a3   : > { %v632_v21 = vrot.slane %v625_v18, %v1707_v45 }
 0x1a5   : > { %v634_v22 = vadd.f32 %v632_v21, %v425_v20 }
 0x1a6   : > { %v817_v31 = vpop.permute.xlu1 %816 }
 0x1a7   : > { %636 = vst.msk [vmem:[#allocation2] sm:$0x1] %vm635_vm2, %v634_v22  ;;  %v825_v24 = vrot.slane %v817_v31, %v615_v12 }
 0x1a9   : > { %v826_v25 = vsel %vm617_vm1, %v825_v24, %v821_v23 }
 0x1aa   : > { %v833_v34 = vrot.slane %v826_v25, %v1707_v45  ;;  %847 = sbr.rel (%p1060_p5) target bundleno = 1191 (0x4a7), region = 68 }
 0x1ac   : > { %v840_v27 = vrot.slane %v833_v34, %v1707_v45 }
 0x1ae   : > { %v842_v28 = vadd.f32 %v840_v27, %v637_v26  ;;  %v848_v30 = vld [vmem:[#allocation2] sm:$0x1] (!%p1060_p5) }
 0x1b0   : > { %843 = vst.msk [vmem:[#allocation3] sm:$0x1] %vm635_vm2, %v842_v28 }
 0x1b7   : > { %v1061_v29 = vld [vmem:[#allocation3] ss:$0 sm:$0xff] }
 0x1b8   : > { %855 = vrot.lane.b32.xlu0 %v1061_v29, %s1386_s26 }
 0x22a   : > { %v856_v32 = vpop.permute.xlu0 %855 }
 0x22b   : > { %v859_v33 = vsel %vm858_vm3, %v848_v30, %v856_v32 }
 0x22c   : > { %v860_v35 = vmul.f32 0.0009765625, %v859_v33 }
 0x22e   : > { %v865_v46 = vrot.slane %v860_v35, %v1683_v36 }
 0x230   : > { %v866_v45 = vmul.f32 %v865_v46, %v861_v44 }
 0x232   : > { %v868_v47 = vsel %vm867_vm4, %v866_v45, 0.0 }
 0x233   : > { %869 = vadd.xlane.f32.xlu0 %v868_v47 }
 0x2c0   : > { %v870_v49 = vpop.xlane.xlu0 %869 }
 0x2c1   : > { %v872_v50 = vadd.f32 %v871_v48, %v870_v49 }
 0x2c3   : > { %v873_v52 = vmax.f32 %v872_v50, 0.0 }
 0x2c5   : > { %v875_v53 = vmul.f32 %v874_v51, %v873_v52 }
 0x2c7   : > { %v877_v54 = vsel %vm876_vm5, %v875_v53, 0.0 }
 0x2c8   : > { %v878_v55 = vrot.slane %v877_v54, 4 }
 0x2ca   : > { %v879_v36 = vadd.f32 %v878_v55, %v877_v54 }
 0x2cc   : > { %v880_v56 = vrot.slane %v879_v36, 2 }
 0x2ce   : > { %v881_v57 = vadd.f32 %v880_v56, %v879_v36 }
 0x2d0   : > { %v882_v58 = vrot.slane %v881_v57, 1 }
 0x2d2   : > { %v883_v37 = vadd.f32 %v882_v58, %v881_v57 }
 0x2d4   : > { %v885_v60 = vadd.f32 %v884_v59, %v883_v37 }
 0x2d6   : > { %v886_v61 = vsub.f32 0.0, %v885_v60 }
 0x2d8   : > { %v887_v62 = vmul.f32 1.442695, %v886_v61 }
 0x2da   : > { %1182 = vpow2.f32 %v887_v62 }
 0x2e4   : > { %v1183_v63 = vpop.eup %1182 }
 0x2e5   : > { %v889_v0 = vadd.f32 1.0, %v1183_v63 }
 0x2e7   : > { %1184 = vrcp.f32 %v889_v0 }
 0x2f1   : > { %v1185_v38 = vpop.eup %1184 }
 0x2f2   : > { %v891_v1 = vsub.f32 1.0, %v1185_v38 }
 0x2f4   : > { %893 = vrot.lane.b32.xlu1 %v891_v1, %s1387_s23 }
 0x366   : > { %v894_v39 = vpop.permute.xlu1 %893 }
 0x367   : > { %v897_v40 = vsel %vm896_vm6, %v1185_v38, %v894_v39 }
 0x368   : > { %v900_v41 = vmul.f32 %v899_v2, %v897_v40 }
 0x36a   : > { %v902_v42 = vadd.f32 %v901_v3, %v900_v41 }
 0x36c   : > { %v904_v43 = vsel %vm903_vm7, %v902_v42, -inf }
 0x36d   : > { %905 = vmax.xlane.f32.xlu1 %v904_v43 }
 0x3fa   : > { %v906_v4 = vpop.xlane.xlu1 %905 }
 0x3fb   : > { %v907_v5 = vsub.f32 %v902_v42, %v906_v4 }
 0x3fd   : > { %v908_v6 = vmul.f32 1.442695, %v907_v5 }
 0x3ff   : > { %1186 = vpow2.f32 %v908_v6 }
 0x409   : > { %v1187_v7 = vpop.eup %1186 }
 0x40a   : > { %v910_v8 = vsel %vm903_vm7, %v1187_v7, 0.0 }
 0x40b   : > { %911 = vadd.xlane.f32.xlu0 %v910_v8 }
 0x498   : > { %v912_v9 = vpop.xlane.xlu0 %911 }
 0x499   : > { %1188 = vrcp.f32 %v912_v9 }
 0x4a3   : > { %v1189_v10 = vpop.eup %1188 }
 0x4a4   : > { %v914_v11 = vmul.f32 %v1189_v10, %v1187_v7 }
 0x4a6   : > { %915 = vst.msk [vmem:[%s1668_s25] sm:$0x1] %vm903_vm7, %v914_v11 }
 0x4a7 PF: > { %s1062_s12 = sshll.u32 %s1364_s14, 4  ;;  %s929_s28 = sshll.u32 %s1668_s25, 4  ;;  %s930_s28 = int_to_ptr.vmem [resolvable:$true] %s929_s28 }
 0x4a8   : > { %s1793_s20 = scalar_lea.hbm %s1860_s8, %s1062_s12  ;;  %s917_s30 = scalar_lea.sflag [#allocation8], %s395_s1 }
 0x4a9   : > { %s1250_s26 = scalar_lea.vmem %s930_s28, 16  ;;  %p1894_p11 = scmp.ne.s32.totalorder %s1881_s29, 0 }
 0x4aa   : > { %p1251_p1 = scmp.ne.s32.totalorder %s930_s28, %s1250_s26  ;;  %s1388_s21 = smov [#allocation11]  }
 0x4ab   : > { %s1254_s11 = sshll.u32 %s1388_s21, 4  ;;  %s1255_s11 = int_to_ptr.vmem [resolvable:$false] %s1254_s11 }
 0x4ac   : > { %p1252_p13 = pnand %p1251_p1, %p1894_p11  ;;  %s1256_s6 = scalar_lea.vmem %s1255_s11, 32 }
 0x4ad   : > { %p1257_p2 = scmp.lt.s32.totalorder %s930_s28, %s1255_s11  ;;  %p1258_p9 = scmp.lt.s32.totalorder %s1256_s6, %s1250_s26 }
 0x4ae   : > { %p1253_p12 = pneg %p1252_p13 }
 0x4af   : > { %p1259_p0 = por %p1258_p9, %p1257_p2 }
 0x4b1   : > { %p1260_p6 = pnand %p1259_p0, %p1253_p12 }
 0x4b3   : > { %1263 = shalt.err (!%p1260_p6)
}
 0x4b4   : > { %s1264_s14 = scalar_lea.hbm %s1793_s20, 16  ;;  %s1268_s15 = scalar_lea.hbm %s1860_s8, 32 }
 0x4b5   : > { %p1265_p8 = scmp.ne.s32.totalorder %s1793_s20, %s1264_s14  ;;  %p1269_p4 = scmp.lt.u32.totalorder %s1793_s20, %s1860_s8 }
 0x4b6   : > { %p1270_p3 = scmp.lt.u32.totalorder %s1268_s15, %s1264_s14  ;;  %p1272_p1 = scmp.lt.u32.totalorder %s1264_s14, %s1793_s20 }
 0x4b7   : > { %p1266_p10 = pnand %p1265_p8, %p1894_p11 }
 0x4b8   : > { %p1271_p5 = por %p1270_p3, %p1269_p4 }
 0x4b9   : > { %p1267_p7 = pneg %p1266_p10 }
 0x4ba   : > { %p1273_p13 = por %p1272_p1, %p1271_p5 }
 0x4bc   : > { %p1274_p12 = pnand %p1273_p13, %p1267_p7 }
 0x4be   : > { %1277 = shalt.err (!%p1274_p12)
}
 0x4bf   : > { %1069 = dma.vmem_to_hbm [thread:$0]  (%p1894_p11), %s930_s28, 16, %s1793_s20, %s917_s30  }
 0x4c0 PF: > { %s1895_s23 = sld [smem:[#allocation23_spill]]  ;;  %p1083_p2 = scmp.ge.s32.totalorder %s1376_s17, 2 }
 0x4c1   : > { %s941_s24 = sand.u32 1, %s1336_s9  }
 0x4c2   : > { %s942_s13 = scalar_lea.sflag [#allocation8], %s941_s24 }
 0x4c6   : > { %p1896_p9 = scmp.ne.s32.totalorder %s1895_s23, 0 }
 0x4c8   : > { %p1079_p0 = pnand %p1083_p2, %p1896_p9 }
 0x4ca   : > { %1331 = dma.done.wait (!%p1079_p0), %s942_s13, 16  }
 0x4cb   : > { %1333 = vsyncadd (!%p1079_p0), %s942_s13, 4294967280  ;;  %s30_s17 = sadd.s32 1, %s1376_s17   ;;  %s1897_s19 = sld [smem:[#allocation15_spill]] }
 0x4cc   : > { %p27_p6 = scmp.ge.s32.totalorder %s30_s17, 6   ;;  %s1898_s11 = sld [smem:[#allocation21_spill]] }
 0x4cd   : > { %s1899_s29 = sld [smem:[#allocation16_spill]]  ;;  %s1900_s13 = sld [smem:[#allocation22_spill]] }
 0x4ce   : > { %s1901_s6 = sld [smem:[#allocation17_spill]]  ;;  %s1902_s14 = sld [smem:[#allocation18_spill]] }
 0x4cf   : > { %s1903_s15 = sld [smem:[#allocation19_spill]]  ;;  %s1904_s16 = sld [smem:[#allocation20_spill]] }
 0x4d0   : > { %s1905_s9 = smov %s1340_s10  ;;  %s1907_s12 = smov %s1352_s0 }
 0x4d1   : > { %s1906_s10 = smov %s1897_s19  ;;  %29 = sbr.rel (!%p27_p6) target bundleno = 14 (0xe), region = 121 }
 0x4d3   : > { %s1908_s0 = smov %s1899_s29 }
 0x4d8   :  { %946 = vsyncpa [#allocation7], 1 }
 0x4d9   :  { %948 = vsyncpa [#allocation7 + $0x1], 1 }
 0x4da   :  { %949 = vsyncpa [#allocation10], 1 }
 0x4db   :  { %951 = vsyncpa [#allocation10 + $0x1], 1 }
 0x4dc   :  { %952 = vsyncpa [#allocation8], 1 }
 0x4dd   :  { %954 = vsyncpa [#allocation8 + $0x1], 1 }

</bundles_post_ra>
